<compile_context>
chip_gen: v7x
topology: tpu7x:2x2x1
jax: 0.10.0
libtpu: 0.0.40
codegen_flags: <defaults>
</compile_context>

<pallas_src>
from functools import partial

import jax
import jax.numpy as jnp
from jax import lax
from jax.experimental import pallas as pl
from jax.experimental.pallas import tpu as pltpu

INV_SQRT2 = 0.7071067811865476
SQRT_2_OVER_PI = 0.7978845608028654


def _downscale_kernel(x_ref, scale_ref, shift_ref, w_ref, o_ref, *, approx_gelu):
    # x_ref:     (1, Kp, tp)    per-image patch tile, P=(ho,wo) lane-dense on last axis
    # scale_ref: (Kp, 1)        folded BatchNorm scale (resident; constant index_map)
    # shift_ref: (Kp, 1)        folded BatchNorm shift (resident)
    # w_ref:     (out_c, Kp)    conv weight, k-order = (c, i, j) (resident)
    # o_ref:     (1, out_c, tp) direct slab of the NCHW output (N, out_c, Ho*Wo)
    x = x_ref[0].astype(jnp.float32)
    xn = x * scale_ref[...] + shift_ref[...]                 # BatchNorm2d (inference), f32
    if approx_gelu:
        # tanh-approx GELU: transcendental goes to the EUP slot (frees VALU on v6e/v7x).
        xa = 0.5 * xn * (1.0 + jnp.tanh(SQRT_2_OVER_PI * (xn + 0.044715 * xn * xn * xn)))
    else:
        xa = 0.5 * xn * (1.0 + lax.erf(xn * INV_SQRT2))      # exact GELU (nn.GELU default)
    o_ref[0] = jnp.dot(
        w_ref[...], xa.astype(w_ref.dtype), preferred_element_type=jnp.float32
    ).astype(o_ref.dtype)


def _round_up(x, m):
    return ((x + m - 1) // m) * m


def _has_two_tensorcores():
    """v7x has 2 TensorCores per chip; v5e/v6e have 1."""
    try:
        dev = jax.devices()[0]
        kind = str(getattr(dev, "device_kind", "")).lower()
        if "v7" in kind:
            return True
        return int(getattr(dev, "num_cores", 1)) > 1
    except Exception:
        return False


def _pick_tp(P, Kp, out_c, x_itemsize, n_batch, two_tc, tile_p):
    """Lane tile along the per-image patch axis P = Ho*Wo."""
    if tile_p is not None:
        return P if tile_p >= P else min(P, _round_up(tile_p, 128))
    per_col = Kp * x_itemsize + out_c * 4          # input + f32-output bytes per column
    tp = (8 << 20) // max(per_col, 1)              # ~8 MiB/step -> ~16 MiB double-buffered
    tp = _round_up(max(512, min(65536, tp)), 128)
    if tp >= P:
        tp = P                                     # full-dim block: always legal, no padding
        if two_tc and n_batch == 1 and P >= 256:
            # 2-TC chips (v7x): keep >= 2 grid steps so both TensorCores get work.
            tp = min(P, _round_up(pl.cdiv(P, 2), 128))
    return tp


@partial(jax.jit, static_argnames=("scale", "eps", "matmul_dtype", "approx_gelu", "tile_p"))
def downscale_forward(x, conv_w, bn_gamma, bn_beta, bn_mean, bn_var, *, scale,
                      eps=1e-5, matmul_dtype=jnp.float32, approx_gelu=False, tile_p=None):
    """x: (N, C, H, W) float32.  conv_w: (out_c, C, scale, scale).  Returns NCHW."""
    N, C, H, W = x.shape
    out_c = conv_w.shape[0]
    s = scale
    Ho, Wo = H // s, W // s
    K = C * s * s
    Kp = _round_up(K, 8)                 # dense sublanes for the VALU-heavy BN+GELU stage
    P = Ho * Wo                          # per-image patch count (lane axis)

    # ---- single wrapper pass: NCHW -> per-image patch matrix (N, Kp, P) ----
    # (crops a ragged border exactly like a VALID stride-s conv; k-order = (c, i, j))
    xp = (x[:, :, :Ho * s, :Wo * s]
          .reshape(N, C, Ho, s, Wo, s)
          .transpose(0, 1, 3, 5, 2, 4)
          .reshape(N, K, P))
    if Kp != K:
        xp = jnp.pad(xp, ((0, 0), (0, Kp - K), (0, 0)))
    xp = xp.astype(matmul_dtype)
    # TODO(synk): fuse this patchify pass into the kernel (read (C, s*band, W) blocks
    # straight from NCHW) once an in-kernel stride-s lane deinterleave is available.

    # conv weight (out_c, C, s, s) -> (out_c, Kp); zero columns for the padded K rows.
    wmat = conv_w.reshape(out_c, K)
    if Kp != K:
        wmat = jnp.pad(wmat, ((0, 0), (0, Kp - K)))
    wmat = wmat.astype(matmul_dtype)

    # fold BatchNorm (inference) into per-patch-row scale/shift (f32 on every chip).
    ch_scale = bn_gamma / jnp.sqrt(bn_var + eps)              # (C,)
    ch_shift = bn_beta - bn_mean * ch_scale                   # (C,)
    row_scale = jnp.repeat(ch_scale, s * s)
    row_shift = jnp.repeat(ch_shift, s * s)
    if Kp != K:
        row_scale = jnp.pad(row_scale, (0, Kp - K))
        row_shift = jnp.pad(row_shift, (0, Kp - K))
    row_scale = row_scale.reshape(Kp, 1).astype(jnp.float32)
    row_shift = row_shift.reshape(Kp, 1).astype(jnp.float32)

    x_itemsize = jnp.dtype(matmul_dtype).itemsize
    two_tc = _has_two_tensorcores()
    tp = _pick_tp(P, Kp, out_c, x_itemsize, N, two_tc, tile_p)
    n_tiles = pl.cdiv(P, tp)

    # scoped-VMEM budget: double-buffered streaming blocks + residents + headroom
    # (v5e's default scoped limit is only 16 MiB, so set it explicitly).
    need = (2 * (Kp * tp * x_itemsize + out_c * tp * 4)
            + 2 * (2 * Kp * 4 + out_c * Kp * x_itemsize) + (4 << 20))
    vmem_limit = int(min(48 << 20, max(32 << 20, need)))

    out3 = pl.pallas_call(
        partial(_downscale_kernel, approx_gelu=approx_gelu),
        out_shape=jax.ShapeDtypeStruct((N, out_c, P), jnp.float32),
        grid_spec=pltpu.PrefetchScalarGridSpec(
            num_scalar_prefetch=0,
            grid=(N, n_tiles),
            in_specs=[
                pl.BlockSpec((1, Kp, tp), lambda n, t: (n, 0, t)),   # streaming patch tile
                pl.BlockSpec((Kp, 1), lambda n, t: (0, 0)),          # resident BN scale
                pl.BlockSpec((Kp, 1), lambda n, t: (0, 0)),          # resident BN shift
                pl.BlockSpec((out_c, Kp), lambda n, t: (0, 0)),      # resident weights
            ],
            out_specs=pl.BlockSpec((1, out_c, tp), lambda n, t: (n, 0, t)),  # NCHW slab
        ),
        compiler_params=pltpu.CompilerParams(
            dimension_semantics=("parallel", "parallel"),
            vmem_limit_bytes=vmem_limit,
        ),
    )(xp, row_scale, row_shift, wmat)

    # (N, out_c, Ho*Wo) -> NCHW is metadata-only (no extra HBM pass).
    return out3.reshape(N, out_c, Ho, Wo)


def downscale_reference(x, conv_w, bn_gamma, bn_beta, bn_mean, bn_var, scale, eps=1e-5):
    """Pure-JAX reference mirroring BatchNorm2d(eval) -> GELU -> Conv2d(stride=kernel)."""
    g = bn_gamma[None, :, None, None]
    b = bn_beta[None, :, None, None]
    m = bn_mean[None, :, None, None]
    v = bn_var[None, :, None, None]
    xn = (x - m) / jnp.sqrt(v + eps) * g + b
    xa = 0.5 * xn * (1.0 + lax.erf(xn * INV_SQRT2))
    return lax.conv_general_dilated(
        xa, conv_w, window_strides=(scale, scale), padding="VALID",
        dimension_numbers=("NCHW", "OIHW", "NCHW"),
    )


def _make_inputs(key, N, in_c, H, W, out_c, scale):
    k1, k2, k3, k4, k5, k6 = jax.random.split(key, 6)
    x = jax.random.normal(k1, (N, in_c, H, W), dtype=jnp.float32)
    conv_w = jax.random.normal(k2, (out_c, in_c, scale, scale), dtype=jnp.float32) * 0.1
    bn_gamma = 1.0 + 0.1 * jax.random.normal(k3, (in_c,), dtype=jnp.float32)
    bn_beta = 0.1 * jax.random.normal(k4, (in_c,), dtype=jnp.float32)
    bn_mean = 0.1 * jax.random.normal(k5, (in_c,), dtype=jnp.float32)
    bn_var = jnp.abs(1.0 + 0.1 * jax.random.normal(k6, (in_c,), dtype=jnp.float32))
    return x, conv_w, bn_gamma, bn_beta, bn_mean, bn_var


if __name__ == "__main__":
    key = jax.random.PRNGKey(0)

    # Case 1: shapes from the original module usage.
    N, in_c, H, W, out_c, scale = 2, 4, 16, 16, 8, 2
    args = _make_inputs(key, N, in_c, H, W, out_c, scale)
    out = jax.block_until_ready(downscale_forward(*args, scale=scale))
    ref = downscale_reference(*args, scale)
    assert out.shape == (N, out_c, H // scale, W // scale)
    assert jnp.allclose(out, ref, atol=1e-4, rtol=1e-4), "f32 mismatch vs reference"

    # Optional bf16 MXU-operand path (halves X HBM reads on v6e/v7x); looser tolerance.
    out_bf16 = jax.block_until_ready(
        downscale_forward(*args, scale=scale, matmul_dtype=jnp.bfloat16))
    assert jnp.allclose(out_bf16, ref, atol=2e-1, rtol=2e-1), "bf16 mismatch vs reference"

    # Optional tanh-approx GELU (EUP slot) variant; small, bounded approximation error.
    out_tanh = jax.block_until_ready(
        downscale_forward(*args, scale=scale, approx_gelu=True))
    assert jnp.allclose(out_tanh, ref, atol=5e-2, rtol=5e-2), "tanh-GELU mismatch"

    # Case 2: awkward sizes (odd channels, K=12 padded to 16, full-dim P=35 tile).
    key2 = jax.random.PRNGKey(1)
    N2, in_c2, H2, W2, out_c2, scale2 = 3, 3, 10, 14, 5, 2
    args2 = _make_inputs(key2, N2, in_c2, H2, W2, out_c2, scale2)
    out2 = jax.block_until_ready(downscale_forward(*args2, scale=scale2))
    ref2 = downscale_reference(*args2, scale2)
    assert out2.shape == (N2, out_c2, H2 // scale2, W2 // scale2)
    assert jnp.allclose(out2, ref2, atol=1e-4, rtol=1e-4), "padded-K case mismatch"

    # Case 3: force multiple lane tiles per image + a partial edge block (P=160, tp=128).
    key3 = jax.random.PRNGKey(2)
    N3, in_c3, H3, W3, out_c3, scale3 = 2, 4, 16, 40, 8, 2
    args3 = _make_inputs(key3, N3, in_c3, H3, W3, out_c3, scale3)
    out3 = jax.block_until_ready(downscale_forward(*args3, scale=scale3, tile_p=128))
    ref3 = downscale_reference(*args3, scale3)
    assert out3.shape == (N3, out_c3, H3 // scale3, W3 // scale3)
    assert jnp.allclose(out3, ref3, atol=1e-4, rtol=1e-4), "edge-block case mismatch"

    print("KERNEL_OK")
</pallas_src>

<mosaic_0001>
module attributes {stable_mosaic.version = 11 : i64} {
  func.func @_downscale_kernel(%arg0: i32, %arg1: i32, %arg2: memref<1x16x64xf32, #tpu.memory_space<vmem>>, %arg3: memref<16x1xf32, #tpu.memory_space<vmem>>, %arg4: memref<16x1xf32, #tpu.memory_space<vmem>>, %arg5: memref<8x16xf32, #tpu.memory_space<vmem>>, %arg6: memref<1x8x64xf32, #tpu.memory_space<vmem>>) attributes {dimension_semantics = [#tpu.dimension_semantics<parallel>, #tpu.dimension_semantics<parallel>], iteration_bounds = array<i64: 2, 1>, scalar_prefetch = 0 : i64, scratch_operands = 0 : i64, tpu.core_type = #tpu.core_type<tc>, window_params = [{transform_indices = @transform_0, window_bounds = array<i64: 1, 16, 64>}, {pipeline_mode = #tpu.pipeline_mode<synchronous>, transform_indices = @transform_1, window_bounds = array<i64: 16, 1>}, {pipeline_mode = #tpu.pipeline_mode<synchronous>, transform_indices = @transform_2, window_bounds = array<i64: 16, 1>}, {pipeline_mode = #tpu.pipeline_mode<synchronous>, transform_indices = @transform_3, window_bounds = array<i64: 8, 16>}, {transform_indices = @transform_4, window_bounds = array<i64: 1, 8, 64>}]} {
    %c0 = arith.constant 0 : index
    %c0_0 = arith.constant 0 : index
    %c0_1 = arith.constant 0 : index
    %0 = vector.load %arg2[%c0, %c0_0, %c0_1] : memref<1x16x64xf32, #tpu.memory_space<vmem>>, vector<1x16x64xf32>
    %1 = vector.shape_cast %0 : vector<1x16x64xf32> to vector<16x64xf32>
    %c0_2 = arith.constant 0 : index
    %c0_3 = arith.constant 0 : index
    %2 = vector.load %arg3[%c0_2, %c0_3] : memref<16x1xf32, #tpu.memory_space<vmem>>, vector<16x1xf32>
    %3 = vector.broadcast %2 : vector<16x1xf32> to vector<16x64xf32>
    %4 = arith.mulf %1, %3 : vector<16x64xf32>
    %c0_4 = arith.constant 0 : index
    %c0_5 = arith.constant 0 : index
    %5 = vector.load %arg4[%c0_4, %c0_5] : memref<16x1xf32, #tpu.memory_space<vmem>>, vector<16x1xf32>
    %6 = vector.broadcast %5 : vector<16x1xf32> to vector<16x64xf32>
    %7 = arith.addf %4, %6 : vector<16x64xf32>
    %cst = arith.constant 5.000000e-01 : f32
    %8 = vector.broadcast %cst : f32 to vector<16x64xf32>
    %9 = arith.mulf %8, %7 : vector<16x64xf32>
    %cst_6 = arith.constant 0.707106769 : f32
    %10 = vector.broadcast %cst_6 : f32 to vector<16x64xf32>
    %11 = arith.mulf %7, %10 : vector<16x64xf32>
    %12 = math.erf %11 : vector<16x64xf32>
    %cst_7 = arith.constant 1.000000e+00 : f32
    %13 = vector.broadcast %cst_7 : f32 to vector<16x64xf32>
    %14 = arith.addf %13, %12 : vector<16x64xf32>
    %15 = arith.mulf %9, %14 : vector<16x64xf32>
    %c0_8 = arith.constant 0 : index
    %c0_9 = arith.constant 0 : index
    %16 = vector.load %arg5[%c0_8, %c0_9] : memref<8x16xf32, #tpu.memory_space<vmem>>, vector<8x16xf32>
    %cst_10 = arith.constant dense<0.000000e+00> : vector<8x64xf32>
    %17 = tpu.matmul %16, %15, %cst_10 {dimension_numbers = #tpu.dot_dimension_numbers<[1], [0], [0], [1], [0, 0, 1, 1], [], []>} : vector<8x16xf32>, vector<16x64xf32>, vector<8x64xf32> -> vector<8x64xf32>
    %c0_11 = arith.constant 0 : index
    %c0_12 = arith.constant 0 : index
    %c0_13 = arith.constant 0 : index
    %18 = vector.load %arg6[%c0_11, %c0_12, %c0_13] : memref<1x8x64xf32, #tpu.memory_space<vmem>>, vector<1x8x64xf32>
    %19 = vector.shape_cast %18 : vector<1x8x64xf32> to vector<8x64xf32>
    %20 = vector.shape_cast %17 : vector<8x64xf32> to vector<1x8x64xf32>
    tpu.vector_store %arg6[%c0_11, %c0_12, %c0_13], %20 {strides = array<i32>} : memref<1x8x64xf32, #tpu.memory_space<vmem>>, vector<1x8x64xf32>,
    return
  }
  func.func @transform_0(%arg0: i32, %arg1: i32) -> (i32, i32, i32) {
    %c0_i32 = arith.constant 0 : i32
    %c0_i32_0 = arith.constant 0 : i32
    return %arg0, %c0_i32, %arg1 : i32, i32, i32
  }
  func.func @transform_1(%arg0: i32, %arg1: i32) -> (i32, i32) {
    %c0_i32 = arith.constant 0 : i32
    %c0_i32_0 = arith.constant 0 : i32
    %c0_i32_1 = arith.constant 0 : i32
    return %c0_i32, %c0_i32_0 : i32, i32
  }
  func.func @transform_2(%arg0: i32, %arg1: i32) -> (i32, i32) {
    %c0_i32 = arith.constant 0 : i32
    %c0_i32_0 = arith.constant 0 : i32
    %c0_i32_1 = arith.constant 0 : i32
    return %c0_i32, %c0_i32_0 : i32, i32
  }
  func.func @transform_3(%arg0: i32, %arg1: i32) -> (i32, i32) {
    %c0_i32 = arith.constant 0 : i32
    %c0_i32_0 = arith.constant 0 : i32
    %c0_i32_1 = arith.constant 0 : i32
    return %c0_i32, %c0_i32_0 : i32, i32
  }
  func.func @transform_4(%arg0: i32, %arg1: i32) -> (i32, i32, i32) {
    %c0_i32 = arith.constant 0 : i32
    %c0_i32_0 = arith.constant 0 : i32
    return %arg0, %c0_i32, %arg1 : i32, i32, i32
  }
}

</mosaic_0001>

<bundles_post_ra>
// kernel: downscale_forward.1
= control target key start
LH: loop header
LB: loop body
LE: loop exit
PB: predicated region body
PF: predicated region fallthrough
CT: control target
= control target key end

     0   :  { %s533_s15 = smov 0   ;;  %s535_s16 = smov 0   ;;  %s585_s0 = inlined_call_operand.vmem [shape: f32[2,16,64], index: 0, kind: input, shape index: {}]   ;;  %s586_s1 = inlined_call_operand.vmem [shape: f32[16,1], index: 1, kind: input, shape index: {}]   ;;  %s587_s2 = inlined_call_operand.vmem [shape: f32[16,1], index: 2, kind: input, shape index: {}]   ;;  %s588_s3 = inlined_call_operand.vmem [shape: f32[8,16], index: 3, kind: input, shape index: {}]   ;;  %s589_s4 = inlined_call_operand.vmem [shape: f32[2,8,64], index: 4, kind: output, shape index: {}]  }
   0x1   :  { %s537_s17 = smov 0  }
   0x2 LB: > { %s26_s18 = sadd.s32 1, %s498_s16  ;;  %p425_p0 = scmp.ge.s32.totalorder %s502_s17, 1  ;;  %s502_s17 = sphi %s537_s17, %s14_s17   ;;  %s498_s16 = sphi %s535_s16, %s591_s16   ;;  %s494_s15 = sphi %s533_s15, %s590_s15  }
   0x3   : > { %p28_p1 = scmp.ge.s32.totalorder %s26_s18, 2  ;;  %p181_p2 = scmp.lt.s32.totalorder %s502_s17, 3 }
   0x5   : > { %s593_s18 = smov (%p28_p1, %s26_s18), 0  ;;  %p182_p3 = pnand %p425_p0, %p181_p2 }
   0x6   : > { %v243_v0 = vld [vmem:[%s587_s2] sm:$0xff] (!%p182_p3)  ;;  %v504_v2 = vmov (!%p182_p3), 0   ;;  %v244_v3 = vld [vmem:[%s587_s2 + $0x8] sm:$0xff] (!%p182_p3)  ;;  %v505_v5 = vmov (!%p182_p3), 0.0|0.0   ;;  %vm506_vm0 = vmmov (!%p182_p3), 0   ;;  %v507_v6 = vmov (!%p182_p3), 0.0  }
   0x7   : > { %185 = sbr.rel (%p182_p3) target bundleno = 379 (0x17b), region = 36  ;;  %v229_v1 = vld [vmem:[%s586_s1] sm:$0xff] (!%p182_p3)  ;;  %475 = vset.pattern.permute.xlu1 (!%p182_p3), %v504_v2  ;;  %474 = vset.pattern.permute.xlu0 (!%p182_p3), %v504_v2  ;;  %v230_v4 = vld [vmem:[%s586_s1 + $0x8] sm:$0xff] (!%p182_p3)  ;;  %p212_p4 = scmp.lt.s32.totalorder (!%p182_p3), %s494_s15, 1  ;;  %vm268_vm1 = vcmask (!%p182_p3), 130048   ;;  %vm342_vm2 = vcmask (!%p182_p3), 523264  }
   0x8   : > { %247 = vperm.xlu1 (!%p182_p3), %475, %v243_v0   ;;  %233 = vperm.xlu0 (!%p182_p3), %474, %v229_v1   ;;  %v267_v28 = vld [vmem:[%s588_s3] sm:$0xff] (!%p182_p3) }
   0x9   : > { %443 = vmatprep.subr.bf16.mxu0 (!%p182_p3), %v505_v5  ;;  %440 = vmatprep.mubr.msk.f32.mxu0 (!%p182_p3), %vm506_vm0, %v507_v6 }
   0xc   : > { %252 = vperm.xlu1 (!%p182_p3), %475, %v244_v3   ;;  %238 = vperm.xlu0 (!%p182_p3), %474, %v230_v4  }
   0xe   : > { %s595_s15 = smov (!%p212_p4, %s494_s15), 1 }
   0xf   : > { %s432_s27 = sshll.u32 %s595_s15, 4  ;;  %s428_s7 = sshll.u32 %s595_s15, 3 }
  0x10   : > { %s219_s30 = scalar_lea.vmem %s585_s0, %s432_s27  ;;  %s226_s10 = scalar_lea.vmem %s589_s4, %s428_s7 }
  0x11   : > { %v227_v7 = vld [vmem:[%s219_s30] sm:$0xff]  ;;  %v228_v11 = vld [vmem:[%s219_s30 + $0x8] sm:$0xff] }
  0x87   : > { %v248_v8 = vpop.permute.xlu1 %247  ;;  %v234_v9 = vpop.permute.xlu0 %233 }
  0x88   : > { %v241_v10 = vmul.f32 %v234_v9, %v227_v7 }
  0x8a   : > { %v255_v12 = vadd.f32 %v248_v8, %v241_v10 }
  0x8b   : > { %v239_v13 = vpop.permute.xlu0 %238  ;;  %v253_v16 = vpop.permute.xlu1 %252 }
  0x8c   : > { %v259_v14 = vmul.f32 0.70710677, %v255_v12  ;;  %v242_v15 = vmul.f32 %v239_v13, %v228_v11  ;;  %v257_v22 = vmul.f32 0.5, %v255_v12 }
  0x8e   : > { %476 = verf.f32 %v259_v14  ;;  %v256_v17 = vadd.f32 %v253_v16, %v242_v15 }
  0x90   : > { %v260_v18 = vmul.f32 0.70710677, %v256_v17  ;;  %v258_v23 = vmul.f32 0.5, %v256_v17 }
  0x92   : > { %478 = verf.f32 %v260_v18 }
  0x98   : > { %v477_v19 = vpop.eup %476 }
  0x99   : > { %v263_v20 = vadd.f32 1.0, %v477_v19 }
  0x9b   : > { %v265_v25 = vmul.f32 %v263_v20, %v257_v22 }
  0x9c   : > { %v479_v21 = vpop.eup %478 }
  0x9d   : > { %v264_v24 = vadd.f32 1.0, %v479_v21 }
  0x9f   : > { %v266_v26 = vmul.f32 %v264_v24, %v258_v23 }
  0xa1   : > { %v444_v27 = vpack.c.bf16 %v266_v26, %v265_v25 }
  0xa3   : > { %445 = vmatpush3.bf16.msra.mxu0 %v444_v27 }
  0xa6   : > { %441 = vmatmul.mubr.msk.f32.vlgmr.msra.gmra.mrb[0].mxu0 %vm268_vm1, %v267_v28 }
 0x179   : > { %v338_v29 = vpop.f32.mrb[0].mxu0 }
 0x17a   : > { %343 = vst.msk [vmem:[%s226_s10] sm:$0xff] %vm342_vm2, %v338_v29  ;;  %v442_v30 = vpop.f32.mrb[1].mxu0 }
 0x17b PF: > { %s14_s17 = sadd.s32 1, %s502_s17   ;;  %s590_s15 = smov %s498_s16 }
 0x17c   : > { %p11_p5 = scmp.ge.s32.totalorder %s14_s17, 4   ;;  %s591_s16 = smov %s593_s18 }
 0x17e   :  { %13 = sbr.rel (!%p11_p5) target bundleno = 2 (0x2), region = 66 }

</bundles_post_ra>
